<compile_context>
chip_gen: v6e
topology: v6e:2x2x1
jax: 0.10.0
libtpu: 0.0.40
codegen_flags: <defaults>
</compile_context>

<pallas_src>
import functools

import jax
import jax.numpy as jnp
from jax.experimental import pallas as pl
from jax.experimental.pallas import tpu as pltpu

ACT_THRES = 6.0  # ReLUN(act_thres=6)


def _round_up(x, m):
    return ((x + m - 1) // m) * m


def conv_bn_relun_kernel(p_ref, w_ref, shift_ref, o_ref, acc_ref):
    # p_ref: (tm, tk) bf16   w_ref: (tk, OCp) bf16 (BN scale already folded in)
    # shift_ref: (1, OCp) f32   o_ref: (tm, OCp)   acc_ref: (tm, OCp) f32 scratch
    k = pl.program_id(1)

    @pl.when(k == 0)
    def _init():
        acc_ref[...] = jnp.zeros_like(acc_ref)

    acc_ref[...] += jnp.dot(p_ref[...], w_ref[...],
                            preferred_element_type=jnp.float32)

    @pl.when(k == pl.num_programs(1) - 1)
    def _finalize():
        y = acc_ref[...] + shift_ref[...]
        o_ref[...] = jnp.clip(y, 0.0, ACT_THRES).astype(o_ref.dtype)


def conv_block_forward(x, weight, gamma, beta, running_mean, running_var,
                       *, stride=1, padding=0, eps=1e-5,
                       tm=512, max_tk=1024, out_dtype=jnp.float32):
    """x: (N, C, H, W) float32; weight: (OC, C, KH, KW) (PyTorch OIHW)."""
    N, C, H, W = x.shape
    OC, _, KH, KW = weight.shape
    OH = (H + 2 * padding - KH) // stride + 1
    OW = (W + 2 * padding - KW) // stride + 1
    K = C * KH * KW
    M = N * OH * OW

    # ---- im2col (glue, bf16 to halve the materialized patch bytes) ----
    x16 = x.astype(jnp.bfloat16)
    xp = jnp.pad(x16, ((0, 0), (0, 0), (padding, padding), (padding, padding)))
    cols = []
    for i in range(KH):
        for j in range(KW):
            cols.append(xp[:, :, i:i + stride * OH:stride, j:j + stride * OW:stride])
    patches = jnp.stack(cols, axis=0)            # (KH*KW, N, C, OH, OW)
    patches = patches.transpose(1, 3, 4, 2, 0)   # (N, OH, OW, C, KH*KW)
    patches = patches.reshape(M, K)              # K ordering: C-major, kh*KW+kw minor

    # ---- fold BatchNorm2d (eval mode): scale into weights, shift kept separate ----
    inv_std = jax.lax.rsqrt(running_var.astype(jnp.float32) + eps)
    scale = gamma.astype(jnp.float32) * inv_std                       # (OC,)
    shift = beta.astype(jnp.float32) - running_mean.astype(jnp.float32) * scale
    w_fold = weight.astype(jnp.float32) * scale[:, None, None, None]  # (OC, C, KH, KW)
    # weight (OC, C, KH, KW) -> (K, OC); K ordering matches the im2col above.
    w2d = w_fold.reshape(OC, K).T.astype(jnp.bfloat16)                # (K, OC)

    # ---- pad OC to a lane-dense multiple of 128 (unmasked vst, full MXU N) ----
    OCp = _round_up(OC, 128)
    w2d = jnp.pad(w2d, ((0, 0), (0, OCp - OC)))
    shift2 = jnp.pad(shift.reshape(1, OC), ((0, 0), (0, OCp - OC)))

    # ---- K tiling: single full-K block for small K, else 128-aligned chunks ----
    if K <= max_tk:
        tk, K_pad = K, K
    else:
        tk = max_tk                      # multiple of 128
        K_pad = _round_up(K, tk)
    nk = K_pad // tk

    # ---- M tiling: big tiles, but keep >= 2 parallel steps when possible (v7x) ----
    tm_cap = 128 * max(1, (_round_up(M, 128) // 128) // 2)
    tm_eff = max(128, min(_round_up(tm, 128), tm_cap))
    M_pad = _round_up(M, tm_eff)
    nm = M_pad // tm_eff

    patches = jnp.pad(patches, ((0, M_pad - M), (0, K_pad - K)))
    if K_pad > K:
        w2d = jnp.pad(w2d, ((0, K_pad - K), (0, 0)))

    # ---- explicit VMEM budget (double-buffered inputs/outputs + f32 scratch) ----
    vmem_bytes = (2 * tm_eff * tk * 2        # bf16 patch tiles
                  + 2 * tk * OCp * 2         # bf16 weight tiles
                  + 2 * OCp * 4              # shift
                  + 2 * tm_eff * OCp * 4     # output tiles
                  + tm_eff * OCp * 4)        # accumulator scratch
    vmem_limit = min(64 * 1024 * 1024, max(32 * 1024 * 1024, int(vmem_bytes * 1.5)))

    out = pl.pallas_call(
        conv_bn_relun_kernel,
        out_shape=jax.ShapeDtypeStruct((M_pad, OCp), out_dtype),
        grid_spec=pltpu.PrefetchScalarGridSpec(
            num_scalar_prefetch=0,
            grid=(nm, nk),
            in_specs=[
                pl.BlockSpec((tm_eff, tk), lambda i, k: (i, k)),   # patch tile
                pl.BlockSpec((tk, OCp), lambda i, k: (k, 0)),      # weight tile
                pl.BlockSpec((1, OCp), lambda i, k: (0, 0)),       # BN shift
            ],
            out_specs=pl.BlockSpec((tm_eff, OCp), lambda i, k: (i, 0)),
            scratch_shapes=[pltpu.VMEM((tm_eff, OCp), jnp.float32)],
        ),
        compiler_params=pltpu.CompilerParams(
            dimension_semantics=("parallel", "arbitrary"),
            vmem_limit_bytes=vmem_limit),
    )(patches, w2d, shift2)

    out = out[:M, :OC].reshape(N, OH, OW, OC)
    return out.transpose(0, 3, 1, 2)  # back to NCHW (PyTorch layout parity)


def _reference(x, weight, gamma, beta, running_mean, running_var, eps=1e-5):
    conv = jax.lax.conv_general_dilated(
        x, weight, window_strides=(1, 1), padding="VALID",
        dimension_numbers=("NCHW", "OIHW", "NCHW"))
    OC = weight.shape[0]
    scale = (gamma / jnp.sqrt(running_var + eps)).reshape(1, OC, 1, 1)
    shift = (beta - running_mean * gamma / jnp.sqrt(running_var + eps)).reshape(1, OC, 1, 1)
    return jnp.clip(conv * scale + shift, 0.0, ACT_THRES)


if __name__ == "__main__":
    # ConvBlock(in_channel=4, out_channel=8, kernel_size=3, stride=1, padding=0, bias=False)
    N, C, H, W = 2, 4, 16, 16
    OC, KH, KW = 8, 3, 3

    key = jax.random.PRNGKey(0)
    kx, kw, kg, kb, km, kv = jax.random.split(key, 6)

    x = jax.random.normal(kx, (N, C, H, W), dtype=jnp.float32)
    weight = 0.1 * jax.random.normal(kw, (OC, C, KH, KW), dtype=jnp.float32)
    gamma = 1.0 + 0.1 * jax.random.normal(kg, (OC,), dtype=jnp.float32)
    beta = 0.1 * jax.random.normal(kb, (OC,), dtype=jnp.float32)
    running_mean = 0.05 * jax.random.normal(km, (OC,), dtype=jnp.float32)
    running_var = 1.0 + 0.1 * jax.random.uniform(kv, (OC,), dtype=jnp.float32)

    fwd = jax.jit(functools.partial(conv_block_forward, stride=1, padding=0))
    out = fwd(x, weight, gamma, beta, running_mean, running_var)
    out = jax.block_until_ready(out)

    ref = _reference(x, weight, gamma, beta, running_mean, running_var)
    assert out.shape == ref.shape == (N, OC, H - KH + 1, W - KW + 1)
    # bf16 GEMM operands (f32 accumulation) -> loosened tolerance vs f32 reference.
    assert jnp.allclose(out, ref, atol=5e-2, rtol=1e-2), "mismatch vs reference"

    print("KERNEL_OK")
</pallas_src>

<mosaic_0001>
module attributes {stable_mosaic.version = 11 : i64} {
  func.func @conv_bn_relun_kernel(%arg0: i32, %arg1: i32, %arg2: memref<256x36xbf16, #tpu.memory_space<vmem>>, %arg3: memref<36x128xbf16, #tpu.memory_space<vmem>>, %arg4: memref<1x128xf32, #tpu.memory_space<vmem>>, %arg5: memref<256x128xf32, #tpu.memory_space<vmem>>, %arg6: memref<256x128xf32, #tpu.memory_space<vmem>>) attributes {dimension_semantics = [#tpu.dimension_semantics<parallel>, #tpu.dimension_semantics<arbitrary>], iteration_bounds = array<i64: 2, 1>, scalar_prefetch = 0 : i64, scratch_operands = 1 : i64, tpu.core_type = #tpu.core_type<tc>, window_params = [{transform_indices = @transform_0, window_bounds = array<i64: 256, 36>}, {transform_indices = @transform_1, window_bounds = array<i64: 36, 128>}, {pipeline_mode = #tpu.pipeline_mode<synchronous>, transform_indices = @transform_2, window_bounds = array<i64: 1, 128>}, {transform_indices = @transform_3, window_bounds = array<i64: 256, 128>}]} {
    %c0_i32 = arith.constant 0 : i32
    %0 = arith.cmpi eq, %arg1, %c0_i32 : i32
    %1 = arith.extui %0 : i1 to i32
    %c0_i32_0 = arith.constant 0 : i32
    %2 = arith.cmpi ne, %1, %c0_i32_0 : i32
    scf.if %2 {
      %cst_10 = arith.constant 0.000000e+00 : f32
      %12 = vector.broadcast %cst_10 : f32 to vector<256x128xf32>
      %c0_11 = arith.constant 0 : index
      %c0_12 = arith.constant 0 : index
      %13 = vector.load %arg6[%c0_11, %c0_12] : memref<256x128xf32, #tpu.memory_space<vmem>>, vector<256x128xf32>
      tpu.vector_store %arg6[%c0_11, %c0_12], %12 {strides = array<i32>} : memref<256x128xf32, #tpu.memory_space<vmem>>, vector<256x128xf32>,
    } else {
    }
    %c0 = arith.constant 0 : index
    %c0_1 = arith.constant 0 : index
    %3 = vector.load %arg6[%c0, %c0_1] : memref<256x128xf32, #tpu.memory_space<vmem>>, vector<256x128xf32>
    %c0_2 = arith.constant 0 : index
    %c0_3 = arith.constant 0 : index
    %4 = vector.load %arg2[%c0_2, %c0_3] : memref<256x36xbf16, #tpu.memory_space<vmem>>, vector<256x36xbf16>
    %c0_4 = arith.constant 0 : index
    %c0_5 = arith.constant 0 : index
    %5 = vector.load %arg3[%c0_4, %c0_5] : memref<36x128xbf16, #tpu.memory_space<vmem>>, vector<36x128xbf16>
    %cst = arith.constant dense<0.000000e+00> : vector<256x128xf32>
    %6 = tpu.matmul %4, %5, %cst {dimension_numbers = #tpu.dot_dimension_numbers<[1], [0], [0], [1], [0, 0, 1, 1], [], []>} : vector<256x36xbf16>, vector<36x128xbf16>, vector<256x128xf32> -> vector<256x128xf32>
    %7 = arith.addf %3, %6 : vector<256x128xf32>
    %c0_6 = arith.constant 0 : index
    %c0_7 = arith.constant 0 : index
    %8 = vector.load %arg6[%c0_6, %c0_7] : memref<256x128xf32, #tpu.memory_space<vmem>>, vector<256x128xf32>
    tpu.vector_store %arg6[%c0_6, %c0_7], %7 {strides = array<i32>} : memref<256x128xf32, #tpu.memory_space<vmem>>, vector<256x128xf32>,
    %c0_i32_8 = arith.constant 0 : i32
    %9 = arith.cmpi eq, %arg1, %c0_i32_8 : i32
    %10 = arith.extui %9 : i1 to i32
    %c0_i32_9 = arith.constant 0 : i32
    %11 = arith.cmpi ne, %10, %c0_i32_9 : i32
    scf.if %11 {
      %c0_10 = arith.constant 0 : index
      %c0_11 = arith.constant 0 : index
      %12 = vector.load %arg6[%c0_10, %c0_11] : memref<256x128xf32, #tpu.memory_space<vmem>>, vector<256x128xf32>
      %c0_12 = arith.constant 0 : index
      %c0_13 = arith.constant 0 : index
      %13 = vector.load %arg4[%c0_12, %c0_13] : memref<1x128xf32, #tpu.memory_space<vmem>>, vector<1x128xf32>
      %14 = vector.broadcast %13 : vector<1x128xf32> to vector<256x128xf32>
      %15 = arith.addf %12, %14 : vector<256x128xf32>
      %cst_14 = arith.constant 0.000000e+00 : f32
      %cst_15 = arith.constant 6.000000e+00 : f32
      %16 = vector.broadcast %cst_14 : f32 to vector<256x128xf32>
      %17 = arith.maximumf %16, %15 : vector<256x128xf32>
      %18 = vector.broadcast %cst_15 : f32 to vector<256x128xf32>
      %19 = arith.minimumf %18, %17 : vector<256x128xf32>
      %c0_16 = arith.constant 0 : index
      %c0_17 = arith.constant 0 : index
      %20 = vector.load %arg5[%c0_16, %c0_17] : memref<256x128xf32, #tpu.memory_space<vmem>>, vector<256x128xf32>
      tpu.vector_store %arg5[%c0_16, %c0_17], %19 {strides = array<i32>} : memref<256x128xf32, #tpu.memory_space<vmem>>, vector<256x128xf32>,
    } else {
    }
    return
  }
  func.func @transform_0(%arg0: i32, %arg1: i32) -> (i32, i32) {
    %c0_i32 = arith.constant 0 : i32
    return %arg0, %arg1 : i32, i32
  }
  func.func @transform_1(%arg0: i32, %arg1: i32) -> (i32, i32) {
    %c0_i32 = arith.constant 0 : i32
    %c0_i32_0 = arith.constant 0 : i32
    return %arg1, %c0_i32 : i32, i32
  }
  func.func @transform_2(%arg0: i32, %arg1: i32) -> (i32, i32) {
    %c0_i32 = arith.constant 0 : i32
    %c0_i32_0 = arith.constant 0 : i32
    %c0_i32_1 = arith.constant 0 : i32
    return %c0_i32, %c0_i32_0 : i32, i32
  }
  func.func @transform_3(%arg0: i32, %arg1: i32) -> (i32, i32) {
    %c0_i32 = arith.constant 0 : i32
    %c0_i32_0 = arith.constant 0 : i32
    return %arg0, %c0_i32 : i32, i32
  }
}

</mosaic_0001>

<bundles_post_ra>
// kernel: conv_block_forward.1
= control target key start
LH: loop header
LB: loop body
LE: loop exit
PB: predicated region body
PF: predicated region fallthrough
CT: control target
= control target key end

     0   :  { %s1151_s12 = smov 0   ;;  %s1153_s13 = smov 0   ;;  %s1302_s0 = inlined_call_operand.vmem [shape: bf16[512,36], index: 0, kind: input, shape index: {}]   ;;  %s1303_s1 = inlined_call_operand.vmem [shape: bf16[36,128], index: 1, kind: input, shape index: {}]   ;;  %s1304_s2 = inlined_call_operand.vmem [shape: f32[1,128], index: 2, kind: input, shape index: {}]   ;;  %s1305_s3 = inlined_call_operand.vmem [shape: f32[512,128], index: 3, kind: output, shape index: {}]  }
   0x1   :  { %s1155_s14 = smov 0  }
   0x2 LB: > { %s25_s15 = sadd.s32 1, %s1125_s13  ;;  %p956_p0 = scmp.ge.s32.totalorder %s1129_s14, 1  ;;  %s1129_s14 = sphi %s1155_s14, %s13_s14   ;;  %s1125_s13 = sphi %s1153_s13, %s1307_s13   ;;  %s1121_s12 = sphi %s1151_s12, %s1306_s12  }
   0x3   : > { %p27_p1 = scmp.ge.s32.totalorder %s25_s15, 2  ;;  %p166_p2 = scmp.lt.s32.totalorder %s1129_s14, 3 }
   0x5   : > { %s1309_s15 = smov (%p27_p1, %s25_s15), 0  ;;  %p167_p3 = pnand %p956_p0, %p166_p2 }
   0x6   : > { %s957_s20 = sshll.u32 (!%p167_p3), %s1121_s12, 5 }
   0x7   : > { %170 = sbr.rel (%p167_p3) target bundleno = 255 (0xff), region = 32  ;;  %p199_p4 = scmp.lt.s32.totalorder (!%p167_p3), %s957_s20, 63 }
   0xc   : > { %v1088_v0 = vld [vmem:[%s1303_s1 + $0x10] ss:$0 sps:$4 sm:$0x33]   ;;  %vm469_vm0 = vcmask 1041408   ;;  %v1089_v1 = vld [vmem:[%s1303_s1 + $0x8] sm:$0xff]   ;;  %v1090_v3 = vld [vmem:[%s1303_s1] sm:$0xff]  }
   0xd   : > { %1062 = vmatprep.subr.msk.bf16.mxu0 %vm469_vm0, %v1088_v0  ;;  %1063 = vmatprep.subr.msk.bf16.mxu1 %vm469_vm0, %v1088_v0  ;;  %v471_v2 = vsel %vm469_vm0, %v1088_v0, 0  ;;  %s1311_s20 = smov (!%p199_p4, %s957_s20), 63  ;;  %vm420_vm1 = vcmask 293888   ;;  %v1221_v20 = vld [vmem:[%s1304_s2] ss:$0 sm:$0xff] }
   0xe   : > { %1019 = vmatpush3.bf16.msra.mxu0 %v471_v2  ;;  %1059 = vmatpush3.bf16.msra.mxu1 %v471_v2  ;;  %s958_s23 = sshll.u32 %s1311_s20, 2  ;;  %s960_s29 = sshll.u32 %s1311_s20, 3 }
   0xf   : > { %1020 = vmatprep.subr.bf16.mxu0 %v1089_v1  ;;  %1057 = vmatprep.subr.bf16.mxu1 %v1089_v1  ;;  %s1184_s26 = scalar_lea.vmem %s1302_s0, %s958_s23  ;;  %s1231_s5 = scalar_lea.vmem %s1305_s3, %s960_s29 }
  0x10   : > { %v1091_v4 = vld [vmem:[%s1184_s26] sm:$0xff]   ;;  %v1093_v6 = vld [vmem:[%s1184_s26 + $0x8] sm:$0xff]   ;;  %v1095_v8 = vld [vmem:[%s1184_s26 + $0x10] sm:$0xff]  }
  0x11   : > { %v1092_v5 = vld [vmem:[%s1184_s26 + $0x40] sm:$0xff]   ;;  %1024 = vmatprep.mubr.msk.bf16.mxu0 %vm420_vm1, %v1091_v4  ;;  %v1094_v7 = vld [vmem:[%s1184_s26 + $0x48] sm:$0xff]   ;;  %v1096_v9 = vld [vmem:[%s1184_s26 + $0x50] sm:$0xff]  }
  0x12   : > { %1021 = vmatpush3.bf16.msra.mxu0 %v1089_v1  ;;  %1060 = vmatpush3.bf16.msra.mxu1 %v1089_v1  ;;  %v1097_v10 = vld [vmem:[%s1184_s26 + $0x18] sm:$0xff]   ;;  %v1099_v12 = vld [vmem:[%s1184_s26 + $0x20] sm:$0xff]   ;;  %v1101_v14 = vld [vmem:[%s1184_s26 + $0x28] sm:$0xff]  }
  0x13   : > { %1022 = vmatprep.subr.bf16.mxu0 %v1090_v3  ;;  %1058 = vmatprep.subr.bf16.mxu1 %v1090_v3  ;;  %v1098_v11 = vld [vmem:[%s1184_s26 + $0x58] sm:$0xff]   ;;  %v1100_v13 = vld [vmem:[%s1184_s26 + $0x60] sm:$0xff]   ;;  %v1102_v15 = vld [vmem:[%s1184_s26 + $0x68] sm:$0xff]  }
  0x14   : > { %1040 = vmatprep.mubr.msk.bf16.mxu1 %vm420_vm1, %v1092_v5  ;;  %v1103_v16 = vld [vmem:[%s1184_s26 + $0x30] sm:$0xff]   ;;  %v1105_v18 = vld [vmem:[%s1184_s26 + $0x38] sm:$0xff]  }
  0x15   : > { %v1104_v17 = vld [vmem:[%s1184_s26 + $0x70] sm:$0xff]   ;;  %v1106_v19 = vld [vmem:[%s1184_s26 + $0x78] sm:$0xff]  }
  0x16   : > { %1023 = vmatpush3.bf16.msra.mxu0 %v1090_v3  ;;  %1061 = vmatpush3.bf16.msra.mxu1 %v1090_v3 }
  0x19   : > { %1025 = vmatmul.mubr.msk.bf16.vlgmr.msra.gmra.mxu0 %vm420_vm1, %v1093_v6  ;;  %1041 = vmatmul.mubr.msk.bf16.vlgmr.msra.gmra.mxu1 %vm420_vm1, %v1094_v7 }
  0x1a   : > { %1028 = vmatprep.mubr.msk.bf16.mxu0 %vm420_vm1, %v1095_v8  ;;  %1044 = vmatprep.mubr.msk.bf16.mxu1 %vm420_vm1, %v1096_v9 }
  0x21   : > { %1029 = vmatmul.mubr.msk.bf16.gmra.mxu0 %vm420_vm1, %v1097_v10  ;;  %1045 = vmatmul.mubr.msk.bf16.gmra.mxu1 %vm420_vm1, %v1098_v11 }
  0x22   : > { %1032 = vmatprep.mubr.msk.bf16.mxu0 %vm420_vm1, %v1099_v12  ;;  %1048 = vmatprep.mubr.msk.bf16.mxu1 %vm420_vm1, %v1100_v13 }
  0x29   : > { %1033 = vmatmul.mubr.msk.bf16.gmra.mxu0 %vm420_vm1, %v1101_v14  ;;  %1049 = vmatmul.mubr.msk.bf16.gmra.mxu1 %vm420_vm1, %v1102_v15 }
  0x2a   : > { %1036 = vmatprep.mubr.msk.bf16.mxu0 %vm420_vm1, %v1103_v16  ;;  %1052 = vmatprep.mubr.msk.bf16.mxu1 %vm420_vm1, %v1104_v17 }
  0x31   : > { %1037 = vmatmul.mubr.msk.bf16.gmra.mxu0 %vm420_vm1, %v1105_v18  ;;  %1053 = vmatmul.mubr.msk.bf16.gmra.mxu1 %vm420_vm1, %v1106_v19 }
  0xd9   : > { %v1026_v21 = vpop.f32.mrf.mxu0  ;;  %v1042_v22 = vpop.f32.mrf.mxu1 }
  0xda   : > { %v742_v23 = vadd.f32 %v1026_v21, %v1221_v20  ;;  %v758_v24 = vadd.f32 %v1042_v22, %v1221_v20 }
  0xdb   : > { %v507_v25 = vpop.f32.mrf.mxu0  ;;  %v571_v26 = vpop.f32.mrf.mxu1 }
  0xdc   : > { %v774_v27 = vmax.f32 %v742_v23, 0.0  ;;  %v790_v28 = vmax.f32 %v758_v24, 0.0  ;;  %v740_v29 = vadd.f32 %v1221_v20, %v507_v25  ;;  %v756_v30 = vadd.f32 %v1221_v20, %v571_v26 }
  0xdd   : > { %v1027_v31 = vpop.f32.mrf.mxu0  ;;  %v1043_v32 = vpop.f32.mrf.mxu1 }
  0xde   : > { %v806_v33 = vmin.f32 %v774_v27, 6.0  ;;  %v822_v34 = vmin.f32 %v790_v28, 6.0  ;;  %v772_v35 = vmax.f32 %v740_v29, 0.0  ;;  %v788_v36 = vmax.f32 %v756_v30, 0.0 }
  0xdf   : > { %v743_v37 = vadd.f32 %v1027_v31, %v1221_v20  ;;  %v759_v38 = vadd.f32 %v1043_v32, %v1221_v20  ;;  %v510_v39 = vpop.f32.mrf.mxu0  ;;  %v574_v40 = vpop.f32.mrf.mxu1 }
  0xe0   : > { %838 = vst [vmem:[%s1231_s5 + $0x10] sm:$0xff] %v806_v33  ;;  %854 = vst [vmem:[%s1231_s5 + $0x90] sm:$0xff] %v822_v34  ;;  %v804_v41 = vmin.f32 %v772_v35, 6.0  ;;  %v820_v42 = vmin.f32 %v788_v36, 6.0  ;;  %v741_v43 = vadd.f32 %v1221_v20, %v510_v39  ;;  %v757_v44 = vadd.f32 %v1221_v20, %v574_v40 }
  0xe1   : > { %v775_v45 = vmax.f32 %v743_v37, 0.0  ;;  %v791_v46 = vmax.f32 %v759_v38, 0.0  ;;  %v1030_v47 = vpop.f32.mrf.mxu0  ;;  %v1046_v48 = vpop.f32.mrf.mxu1 }
  0xe2   : > { %836 = vst [vmem:[%s1231_s5] sm:$0xff] %v804_v41  ;;  %852 = vst [vmem:[%s1231_s5 + $0x80] sm:$0xff] %v820_v42  ;;  %v773_v49 = vmax.f32 %v741_v43, 0.0  ;;  %v789_v50 = vmax.f32 %v757_v44, 0.0  ;;  %v746_v51 = vadd.f32 %v1030_v47, %v1221_v20  ;;  %v762_v52 = vadd.f32 %v1046_v48, %v1221_v20 }
  0xe3   : > { %v807_v53 = vmin.f32 %v775_v45, 6.0  ;;  %v823_v54 = vmin.f32 %v791_v46, 6.0  ;;  %v523_v55 = vpop.f32.mrf.mxu0  ;;  %v587_v56 = vpop.f32.mrf.mxu1 }
  0xe4   : > { %v805_v57 = vmin.f32 %v773_v49, 6.0  ;;  %v821_v58 = vmin.f32 %v789_v50, 6.0  ;;  %v778_v59 = vmax.f32 %v746_v51, 0.0  ;;  %v794_v60 = vmax.f32 %v762_v52, 0.0 }
  0xe5   : > { %839 = vst [vmem:[%s1231_s5 + $0x18] sm:$0xff] %v807_v53  ;;  %855 = vst [vmem:[%s1231_s5 + $0x98] sm:$0xff] %v823_v54  ;;  %v744_v61 = vadd.f32 %v1221_v20, %v523_v55  ;;  %v760_v62 = vadd.f32 %v1221_v20, %v587_v56  ;;  %v1031_v63 = vpop.f32.mrf.mxu0  ;;  %v1047_v0 = vpop.f32.mrf.mxu1 }
  0xe6   : > { %837 = vst [vmem:[%s1231_s5 + $0x8] sm:$0xff] %v805_v57  ;;  %853 = vst [vmem:[%s1231_s5 + $0x88] sm:$0xff] %v821_v58  ;;  %v810_v1 = vmin.f32 %v778_v59, 6.0  ;;  %v826_v2 = vmin.f32 %v794_v60, 6.0  ;;  %v747_v3 = vadd.f32 %v1031_v63, %v1221_v20  ;;  %v763_v4 = vadd.f32 %v1047_v0, %v1221_v20 }
  0xe7   : > { %v776_v5 = vmax.f32 %v744_v61, 0.0  ;;  %v792_v6 = vmax.f32 %v760_v62, 0.0  ;;  %v526_v7 = vpop.f32.mrf.mxu0  ;;  %v590_v8 = vpop.f32.mrf.mxu1 }
  0xe8   : > { %842 = vst [vmem:[%s1231_s5 + $0x30] sm:$0xff] %v810_v1  ;;  %858 = vst [vmem:[%s1231_s5 + $0xb0] sm:$0xff] %v826_v2  ;;  %v779_v9 = vmax.f32 %v747_v3, 0.0  ;;  %v795_v10 = vmax.f32 %v763_v4, 0.0  ;;  %v745_v11 = vadd.f32 %v1221_v20, %v526_v7  ;;  %v761_v12 = vadd.f32 %v1221_v20, %v590_v8 }
  0xe9   : > { %v808_v13 = vmin.f32 %v776_v5, 6.0  ;;  %v824_v14 = vmin.f32 %v792_v6, 6.0  ;;  %v1034_v15 = vpop.f32.mrf.mxu0  ;;  %v1050_v16 = vpop.f32.mrf.mxu1 }
  0xea   : > { %v811_v17 = vmin.f32 %v779_v9, 6.0  ;;  %v827_v18 = vmin.f32 %v795_v10, 6.0  ;;  %v777_v19 = vmax.f32 %v745_v11, 0.0  ;;  %v793_v21 = vmax.f32 %v761_v12, 0.0 }
  0xeb   : > { %840 = vst [vmem:[%s1231_s5 + $0x20] sm:$0xff] %v808_v13  ;;  %856 = vst [vmem:[%s1231_s5 + $0xa0] sm:$0xff] %v824_v14  ;;  %v750_v22 = vadd.f32 %v1034_v15, %v1221_v20  ;;  %v766_v23 = vadd.f32 %v1050_v16, %v1221_v20  ;;  %v539_v24 = vpop.f32.mrf.mxu0  ;;  %v603_v25 = vpop.f32.mrf.mxu1 }
  0xec   : > { %843 = vst [vmem:[%s1231_s5 + $0x38] sm:$0xff] %v811_v17  ;;  %859 = vst [vmem:[%s1231_s5 + $0xb8] sm:$0xff] %v827_v18  ;;  %v809_v26 = vmin.f32 %v777_v19, 6.0  ;;  %v825_v27 = vmin.f32 %v793_v21, 6.0  ;;  %v748_v28 = vadd.f32 %v1221_v20, %v539_v24  ;;  %v764_v29 = vadd.f32 %v1221_v20, %v603_v25 }
  0xed   : > { %v782_v30 = vmax.f32 %v750_v22, 0.0  ;;  %v798_v31 = vmax.f32 %v766_v23, 0.0  ;;  %v1035_v32 = vpop.f32.mrf.mxu0  ;;  %v1051_v33 = vpop.f32.mrf.mxu1 }
  0xee   : > { %841 = vst [vmem:[%s1231_s5 + $0x28] sm:$0xff] %v809_v26  ;;  %857 = vst [vmem:[%s1231_s5 + $0xa8] sm:$0xff] %v825_v27  ;;  %v780_v34 = vmax.f32 %v748_v28, 0.0  ;;  %v796_v35 = vmax.f32 %v764_v29, 0.0  ;;  %v751_v36 = vadd.f32 %v1035_v32, %v1221_v20  ;;  %v767_v37 = vadd.f32 %v1051_v33, %v1221_v20 }
  0xef   : > { %v814_v38 = vmin.f32 %v782_v30, 6.0  ;;  %v830_v39 = vmin.f32 %v798_v31, 6.0  ;;  %v542_v40 = vpop.f32.mrf.mxu0  ;;  %v606_v41 = vpop.f32.mrf.mxu1 }
  0xf0   : > { %v812_v42 = vmin.f32 %v780_v34, 6.0  ;;  %v828_v43 = vmin.f32 %v796_v35, 6.0  ;;  %v783_v44 = vmax.f32 %v751_v36, 0.0  ;;  %v799_v45 = vmax.f32 %v767_v37, 0.0 }
  0xf1   : > { %846 = vst [vmem:[%s1231_s5 + $0x50] sm:$0xff] %v814_v38  ;;  %862 = vst [vmem:[%s1231_s5 + $0xd0] sm:$0xff] %v830_v39  ;;  %v749_v46 = vadd.f32 %v1221_v20, %v542_v40  ;;  %v765_v47 = vadd.f32 %v1221_v20, %v606_v41  ;;  %v1038_v48 = vpop.f32.mrf.mxu0  ;;  %v1054_v49 = vpop.f32.mrf.mxu1 }
  0xf2   : > { %844 = vst [vmem:[%s1231_s5 + $0x40] sm:$0xff] %v812_v42  ;;  %860 = vst [vmem:[%s1231_s5 + $0xc0] sm:$0xff] %v828_v43  ;;  %v815_v50 = vmin.f32 %v783_v44, 6.0  ;;  %v831_v51 = vmin.f32 %v799_v45, 6.0  ;;  %v754_v52 = vadd.f32 %v1038_v48, %v1221_v20  ;;  %v770_v53 = vadd.f32 %v1054_v49, %v1221_v20 }
  0xf3   : > { %v781_v54 = vmax.f32 %v749_v46, 0.0  ;;  %v797_v55 = vmax.f32 %v765_v47, 0.0  ;;  %v555_v56 = vpop.f32.mrf.mxu0  ;;  %v619_v57 = vpop.f32.mrf.mxu1 }
  0xf4   : > { %847 = vst [vmem:[%s1231_s5 + $0x58] sm:$0xff] %v815_v50  ;;  %863 = vst [vmem:[%s1231_s5 + $0xd8] sm:$0xff] %v831_v51  ;;  %v786_v58 = vmax.f32 %v754_v52, 0.0  ;;  %v802_v59 = vmax.f32 %v770_v53, 0.0  ;;  %v752_v60 = vadd.f32 %v1221_v20, %v555_v56  ;;  %v768_v61 = vadd.f32 %v1221_v20, %v619_v57 }
  0xf5   : > { %v813_v62 = vmin.f32 %v781_v54, 6.0  ;;  %v829_v63 = vmin.f32 %v797_v55, 6.0  ;;  %v1039_v0 = vpop.f32.mrf.mxu0  ;;  %v1055_v1 = vpop.f32.mrf.mxu1 }
  0xf6   : > { %v818_v2 = vmin.f32 %v786_v58, 6.0  ;;  %v834_v3 = vmin.f32 %v802_v59, 6.0  ;;  %v784_v4 = vmax.f32 %v752_v60, 0.0  ;;  %v800_v5 = vmax.f32 %v768_v61, 0.0 }
  0xf7   : > { %845 = vst [vmem:[%s1231_s5 + $0x48] sm:$0xff] %v813_v62  ;;  %861 = vst [vmem:[%s1231_s5 + $0xc8] sm:$0xff] %v829_v63  ;;  %v755_v6 = vadd.f32 %v1039_v0, %v1221_v20  ;;  %v771_v7 = vadd.f32 %v1055_v1, %v1221_v20  ;;  %v558_v8 = vpop.f32.mrf.mxu0  ;;  %v622_v9 = vpop.f32.mrf.mxu1 }
  0xf8   : > { %850 = vst [vmem:[%s1231_s5 + $0x70] sm:$0xff] %v818_v2  ;;  %866 = vst [vmem:[%s1231_s5 + $0xf0] sm:$0xff] %v834_v3  ;;  %v816_v10 = vmin.f32 %v784_v4, 6.0  ;;  %v832_v11 = vmin.f32 %v800_v5, 6.0  ;;  %v753_v12 = vadd.f32 %v1221_v20, %v558_v8  ;;  %v769_v13 = vadd.f32 %v1221_v20, %v622_v9 }
  0xf9   : > { %v787_v14 = vmax.f32 %v755_v6, 0.0  ;;  %v803_v15 = vmax.f32 %v771_v7, 0.0 }
  0xfa   : > { %848 = vst [vmem:[%s1231_s5 + $0x60] sm:$0xff] %v816_v10  ;;  %864 = vst [vmem:[%s1231_s5 + $0xe0] sm:$0xff] %v832_v11  ;;  %v785_v16 = vmax.f32 %v753_v12, 0.0  ;;  %v801_v17 = vmax.f32 %v769_v13, 0.0 }
  0xfb   : > { %v819_v18 = vmin.f32 %v787_v14, 6.0  ;;  %v835_v19 = vmin.f32 %v803_v15, 6.0 }
  0xfc   : > { %v817_v21 = vmin.f32 %v785_v16, 6.0  ;;  %v833_v22 = vmin.f32 %v801_v17, 6.0 }
  0xfd   : > { %851 = vst [vmem:[%s1231_s5 + $0x78] sm:$0xff] %v819_v18  ;;  %867 = vst [vmem:[%s1231_s5 + $0xf8] sm:$0xff] %v835_v19 }
  0xfe   : > { %849 = vst [vmem:[%s1231_s5 + $0x68] sm:$0xff] %v817_v21  ;;  %865 = vst [vmem:[%s1231_s5 + $0xe8] sm:$0xff] %v833_v22 }
  0xff PF: > { %s13_s14 = sadd.s32 1, %s1129_s14   ;;  %s1306_s12 = smov %s1125_s13 }
 0x100   : > { %p10_p5 = scmp.ge.s32.totalorder %s13_s14, 4   ;;  %s1307_s13 = smov %s1309_s15 }
 0x102   :  { %12 = sbr.rel (!%p10_p5) target bundleno = 2 (0x2), region = 73 }

</bundles_post_ra>
